<compile_context>
chip_gen: v6e
topology: v6e:2x2x1
jax: 0.10.0
libtpu: 0.0.40
codegen_flags: <defaults>
</compile_context>

<pallas_src>
import jax
import jax.numpy as jnp
from jax.experimental import pallas as pl
from jax.experimental.pallas import tpu as pltpu

TB_MAX = 1024  # max batch-tile rows (f32 x blocks; safe under v5e 16 MiB scoped VMEM)


def mlp_kernel(x_ref, w1_ref, b1_ref, w2_ref, b2_ref, w3_ref, b3_ref, o_ref):
    # x arrives f32 straight from HBM; cast to bf16 in-kernel so the MXU runs
    # at native bf16 rate without an extra wrapper-side HBM pass.
    x = x_ref[...].astype(jnp.bfloat16)                      # (TB, 784)

    # fc1 + ReLU : (TB, 784) @ (784, 128) -> (TB, 128), f32 accumulate
    h1 = jnp.dot(x, w1_ref[...], preferred_element_type=jnp.float32)
    h1 = jnp.maximum(h1 + b1_ref[...], 0.0).astype(jnp.bfloat16)

    # fc2 + ReLU : (TB, 128) @ (128, 64) -> (TB, 64)
    h2 = jnp.dot(h1, w2_ref[...], preferred_element_type=jnp.float32)
    h2 = jnp.maximum(h2 + b2_ref[...], 0.0).astype(jnp.bfloat16)

    # fc3 : (TB, 64) @ (64, 10) -> (TB, 10), kept in f32
    logits = jnp.dot(h2, w3_ref[...], preferred_element_type=jnp.float32)
    logits = logits + b3_ref[...]

    # log_softmax over dim=1 (last axis), numerically stable, all f32
    m = jnp.max(logits, axis=-1, keepdims=True)
    shifted = logits - m
    lse = jnp.log(jnp.sum(jnp.exp(shifted), axis=-1, keepdims=True))
    o_ref[...] = shifted - lse


def _round_up(n, m):
    return ((n + m - 1) // m) * m


def _batch_tile(B):
    # Multiple of 8 sublanes (f32 x blocks). For mid-size batches aim for at
    # least 2 grid steps so both v7x TensorCores get work; cap at TB_MAX.
    if B <= 8:
        return 8
    half = _round_up(-(-B // 2), 8)
    return max(8, min(TB_MAX, half))


@jax.jit
def mnist_two_layer_forward(x_nchw, params):
    w1, b1, w2, b2, w3, b3 = params
    B = x_nchw.shape[0]

    # x.view(-1, 784): contiguous reshape, no data movement. No dtype cast here.
    x = x_nchw.reshape(B, 784).astype(jnp.float32)

    # Weights -> bf16 (tiny, ~0.2 MiB total); biases stay f32.
    w1 = w1.astype(jnp.bfloat16)
    w2 = w2.astype(jnp.bfloat16)
    w3 = w3.astype(jnp.bfloat16)
    b1 = b1.astype(jnp.float32).reshape(1, 128)
    b2 = b2.astype(jnp.float32).reshape(1, 64)
    b3 = b3.astype(jnp.float32).reshape(1, 10)

    tb = _batch_tile(B)
    grid = (pl.cdiv(B, tb),)  # ragged last tile handled by Pallas; no jnp.pad

    const2d = lambda shape: pl.BlockSpec(shape, lambda i: (0, 0))

    out = pl.pallas_call(
        mlp_kernel,
        out_shape=jax.ShapeDtypeStruct((B, 10), jnp.float32),
        grid=grid,
        in_specs=[
            pl.BlockSpec((tb, 784), lambda i: (i, 0)),   # x: tiled over batch
            const2d((784, 128)),                         # w1 (VMEM-resident)
            const2d((1, 128)),                           # b1
            const2d((128, 64)),                          # w2
            const2d((1, 64)),                            # b2
            const2d((64, 10)),                           # w3
            const2d((1, 10)),                            # b3
        ],
        out_specs=pl.BlockSpec((tb, 10), lambda i: (i, 0)),
        compiler_params=pltpu.CompilerParams(
            dimension_semantics=("parallel",),           # megacore on v7x
            vmem_limit_bytes=32 << 20,                   # explicit, fits all gens
        ),
    )(x, w1, b1, w2, b2, w3, b3)

    return out


def reference_forward(x_nchw, params):
    # Pure-JAX f32 reference matching the PyTorch module.
    w1, b1, w2, b2, w3, b3 = params
    x = x_nchw.reshape(x_nchw.shape[0], 784)
    h1 = jnp.maximum(x @ w1 + b1.reshape(1, -1), 0.0)
    h2 = jnp.maximum(h1 @ w2 + b2.reshape(1, -1), 0.0)
    logits = h2 @ w3 + b3.reshape(1, -1)
    return jax.nn.log_softmax(logits, axis=1)


def init_params(key):
    k1, k2, k3 = jax.random.split(key, 3)
    # Shapes from nn.Linear(784,128)/(128,64)/(64,10), stored as (in, out) so
    # the kernel computes x @ W + b.
    w1 = jax.random.normal(k1, (784, 128), jnp.float32) * (1.0 / 784 ** 0.5)
    b1 = jnp.zeros((1, 128), jnp.float32)
    w2 = jax.random.normal(k2, (128, 64), jnp.float32) * (1.0 / 128 ** 0.5)
    b2 = jnp.zeros((1, 64), jnp.float32)
    w3 = jax.random.normal(k3, (64, 10), jnp.float32) * (1.0 / 64 ** 0.5)
    b3 = jnp.zeros((1, 10), jnp.float32)
    return (w1, b1, w2, b2, w3, b3)


if __name__ == "__main__":
    key = jax.random.PRNGKey(0)
    k_x, k_p = jax.random.split(key)

    # Small MNIST-like batch; B=10 deliberately exercises the ragged last tile
    # (tb=8, grid=(2,)) without any jnp.pad in the wrapper.
    B = 10
    x = jax.random.normal(k_x, (B, 1, 28, 28), jnp.float32)   # NCHW
    params = init_params(k_p)

    out = mnist_two_layer_forward(x, params)
    out = jax.block_until_ready(out)

    assert out.shape == (B, 10)

    # Sanity 1: rows of exp(log_softmax) sum to ~1 (normalization done in f32).
    row_sums = jnp.sum(jnp.exp(out), axis=1)
    assert bool(jnp.all(jnp.abs(row_sums - 1.0) < 1e-3))

    # Sanity 2: matches the pure-JAX f32 reference within bf16-matmul tolerance.
    ref = reference_forward(x, params)
    assert bool(jnp.max(jnp.abs(out - ref)) < 5e-2)

    print("KERNEL_OK")
</pallas_src>

<mosaic_0001>
module attributes {stable_mosaic.version = 11 : i64} {
  func.func @mlp_kernel(%arg0: i32, %arg1: memref<8x784xf32, #tpu.memory_space<vmem>>, %arg2: memref<784x128xbf16, #tpu.memory_space<vmem>>, %arg3: memref<1x128xf32, #tpu.memory_space<vmem>>, %arg4: memref<128x64xbf16, #tpu.memory_space<vmem>>, %arg5: memref<1x64xf32, #tpu.memory_space<vmem>>, %arg6: memref<64x10xbf16, #tpu.memory_space<vmem>>, %arg7: memref<1x10xf32, #tpu.memory_space<vmem>>, %arg8: memref<8x10xf32, #tpu.memory_space<vmem>>) attributes {dimension_semantics = [#tpu.dimension_semantics<parallel>], iteration_bounds = array<i64: 2>, scalar_prefetch = 0 : i64, scratch_operands = 0 : i64, tpu.core_type = #tpu.core_type<tc>, window_params = [{transform_indices = @transform_0, window_bounds = array<i64: 8, 784>}, {pipeline_mode = #tpu.pipeline_mode<synchronous>, transform_indices = @transform_1, window_bounds = array<i64: 784, 128>}, {pipeline_mode = #tpu.pipeline_mode<synchronous>, transform_indices = @transform_2, window_bounds = array<i64: 1, 128>}, {pipeline_mode = #tpu.pipeline_mode<synchronous>, transform_indices = @transform_3, window_bounds = array<i64: 128, 64>}, {pipeline_mode = #tpu.pipeline_mode<synchronous>, transform_indices = @transform_4, window_bounds = array<i64: 1, 64>}, {pipeline_mode = #tpu.pipeline_mode<synchronous>, transform_indices = @transform_5, window_bounds = array<i64: 64, 10>}, {pipeline_mode = #tpu.pipeline_mode<synchronous>, transform_indices = @transform_6, window_bounds = array<i64: 1, 10>}, {transform_indices = @transform_7, window_bounds = array<i64: 8, 10>}]} {
    %c0 = arith.constant 0 : index
    %c0_0 = arith.constant 0 : index
    %0 = vector.load %arg1[%c0, %c0_0] : memref<8x784xf32, #tpu.memory_space<vmem>>, vector<8x784xf32>
    %1 = arith.truncf %0 : vector<8x784xf32> to vector<8x784xbf16>
    %c0_1 = arith.constant 0 : index
    %c0_2 = arith.constant 0 : index
    %2 = vector.load %arg2[%c0_1, %c0_2] : memref<784x128xbf16, #tpu.memory_space<vmem>>, vector<784x128xbf16>
    %cst = arith.constant dense<0.000000e+00> : vector<8x128xf32>
    %3 = tpu.matmul %1, %2, %cst {dimension_numbers = #tpu.dot_dimension_numbers<[1], [0], [0], [1], [0, 0, 1, 1], [], []>} : vector<8x784xbf16>, vector<784x128xbf16>, vector<8x128xf32> -> vector<8x128xf32>
    %c0_3 = arith.constant 0 : index
    %c0_4 = arith.constant 0 : index
    %4 = vector.load %arg3[%c0_3, %c0_4] : memref<1x128xf32, #tpu.memory_space<vmem>>, vector<1x128xf32>
    %5 = vector.broadcast %4 : vector<1x128xf32> to vector<8x128xf32>
    %6 = arith.addf %3, %5 : vector<8x128xf32>
    %cst_5 = arith.constant 0.000000e+00 : f32
    %7 = vector.broadcast %cst_5 : f32 to vector<8x128xf32>
    %8 = arith.maximumf %6, %7 : vector<8x128xf32>
    %9 = arith.truncf %8 : vector<8x128xf32> to vector<8x128xbf16>
    %c0_6 = arith.constant 0 : index
    %c0_7 = arith.constant 0 : index
    %10 = vector.load %arg4[%c0_6, %c0_7] : memref<128x64xbf16, #tpu.memory_space<vmem>>, vector<128x64xbf16>
    %cst_8 = arith.constant dense<0.000000e+00> : vector<8x64xf32>
    %11 = tpu.matmul %9, %10, %cst_8 {dimension_numbers = #tpu.dot_dimension_numbers<[1], [0], [0], [1], [0, 0, 1, 1], [], []>} : vector<8x128xbf16>, vector<128x64xbf16>, vector<8x64xf32> -> vector<8x64xf32>
    %c0_9 = arith.constant 0 : index
    %c0_10 = arith.constant 0 : index
    %12 = vector.load %arg5[%c0_9, %c0_10] : memref<1x64xf32, #tpu.memory_space<vmem>>, vector<1x64xf32>
    %13 = vector.broadcast %12 : vector<1x64xf32> to vector<8x64xf32>
    %14 = arith.addf %11, %13 : vector<8x64xf32>
    %cst_11 = arith.constant 0.000000e+00 : f32
    %15 = vector.broadcast %cst_11 : f32 to vector<8x64xf32>
    %16 = arith.maximumf %14, %15 : vector<8x64xf32>
    %17 = arith.truncf %16 : vector<8x64xf32> to vector<8x64xbf16>
    %c0_12 = arith.constant 0 : index
    %c0_13 = arith.constant 0 : index
    %18 = vector.load %arg6[%c0_12, %c0_13] : memref<64x10xbf16, #tpu.memory_space<vmem>>, vector<64x10xbf16>
    %cst_14 = arith.constant dense<0.000000e+00> : vector<8x10xf32>
    %19 = tpu.matmul %17, %18, %cst_14 {dimension_numbers = #tpu.dot_dimension_numbers<[1], [0], [0], [1], [0, 0, 1, 1], [], []>} : vector<8x64xbf16>, vector<64x10xbf16>, vector<8x10xf32> -> vector<8x10xf32>
    %c0_15 = arith.constant 0 : index
    %c0_16 = arith.constant 0 : index
    %20 = vector.load %arg7[%c0_15, %c0_16] : memref<1x10xf32, #tpu.memory_space<vmem>>, vector<1x10xf32>
    %21 = vector.broadcast %20 : vector<1x10xf32> to vector<8x10xf32>
    %22 = arith.addf %19, %21 : vector<8x10xf32>
    %cst_17 = arith.constant dense<0xFF800000> : vector<8xf32>
    %23 = vector.multi_reduction <maximumf>, %22, %cst_17 [1] : vector<8x10xf32> to vector<8xf32>
    %24 = vector.shape_cast %23 : vector<8xf32> to vector<8x1xf32>
    %25 = vector.broadcast %24 : vector<8x1xf32> to vector<8x10xf32>
    %26 = arith.subf %22, %25 : vector<8x10xf32>
    %27 = math.exp %26 : vector<8x10xf32>
    %cst_18 = arith.constant dense<0.000000e+00> : vector<8xf32>
    %28 = vector.multi_reduction <add>, %27, %cst_18 [1] : vector<8x10xf32> to vector<8xf32>
    %29 = vector.shape_cast %28 : vector<8xf32> to vector<8x1xf32>
    %30 = math.log %29 : vector<8x1xf32>
    %31 = vector.broadcast %30 : vector<8x1xf32> to vector<8x10xf32>
    %32 = arith.subf %26, %31 : vector<8x10xf32>
    %c0_19 = arith.constant 0 : index
    %c0_20 = arith.constant 0 : index
    %33 = vector.load %arg8[%c0_19, %c0_20] : memref<8x10xf32, #tpu.memory_space<vmem>>, vector<8x10xf32>
    tpu.vector_store %arg8[%c0_19, %c0_20], %32 {strides = array<i32>} : memref<8x10xf32, #tpu.memory_space<vmem>>, vector<8x10xf32>,
    return
  }
  func.func @transform_0(%arg0: i32) -> (i32, i32) {
    %c0_i32 = arith.constant 0 : i32
    %c0_i32_0 = arith.constant 0 : i32
    return %arg0, %c0_i32 : i32, i32
  }
  func.func @transform_1(%arg0: i32) -> (i32, i32) {
    %c0_i32 = arith.constant 0 : i32
    %c0_i32_0 = arith.constant 0 : i32
    %c0_i32_1 = arith.constant 0 : i32
    return %c0_i32, %c0_i32_0 : i32, i32
  }
  func.func @transform_2(%arg0: i32) -> (i32, i32) {
    %c0_i32 = arith.constant 0 : i32
    %c0_i32_0 = arith.constant 0 : i32
    %c0_i32_1 = arith.constant 0 : i32
    return %c0_i32, %c0_i32_0 : i32, i32
  }
  func.func @transform_3(%arg0: i32) -> (i32, i32) {
    %c0_i32 = arith.constant 0 : i32
    %c0_i32_0 = arith.constant 0 : i32
    %c0_i32_1 = arith.constant 0 : i32
    return %c0_i32, %c0_i32_0 : i32, i32
  }
  func.func @transform_4(%arg0: i32) -> (i32, i32) {
    %c0_i32 = arith.constant 0 : i32
    %c0_i32_0 = arith.constant 0 : i32
    %c0_i32_1 = arith.constant 0 : i32
    return %c0_i32, %c0_i32_0 : i32, i32
  }
  func.func @transform_5(%arg0: i32) -> (i32, i32) {
    %c0_i32 = arith.constant 0 : i32
    %c0_i32_0 = arith.constant 0 : i32
    %c0_i32_1 = arith.constant 0 : i32
    return %c0_i32, %c0_i32_0 : i32, i32
  }
  func.func @transform_6(%arg0: i32) -> (i32, i32) {
    %c0_i32 = arith.constant 0 : i32
    %c0_i32_0 = arith.constant 0 : i32
    %c0_i32_1 = arith.constant 0 : i32
    return %c0_i32, %c0_i32_0 : i32, i32
  }
  func.func @transform_7(%arg0: i32) -> (i32, i32) {
    %c0_i32 = arith.constant 0 : i32
    %c0_i32_0 = arith.constant 0 : i32
    return %arg0, %c0_i32 : i32, i32
  }
}

</mosaic_0001>

<bundles_post_ra>
// kernel: mnist_two_layer_forward.1
= control target key start
LH: loop header
LB: loop body
LE: loop exit
PB: predicated region body
PF: predicated region fallthrough
CT: control target
= control target key end

     0   :  { %12 = vsyncpa [#allocation3], 0  ;;  %s1858_s0 = inlined_call_operand.vmem [shape: f32[10,784], index: 0, kind: input, shape index: {}]   ;;  %s1859_s1 = inlined_call_operand.vmem [shape: bf16[784,128], index: 1, kind: input, shape index: {}]   ;;  %s1860_s2 = inlined_call_operand.vmem [shape: f32[1,128], index: 2, kind: input, shape index: {}]   ;;  %s1861_s3 = inlined_call_operand.vmem [shape: bf16[128,64], index: 3, kind: input, shape index: {}]   ;;  %s1862_s4 = inlined_call_operand.vmem [shape: f32[1,64], index: 4, kind: input, shape index: {}]   ;;  %s1863_s5 = inlined_call_operand.vmem [shape: bf16[64,10], index: 5, kind: input, shape index: {}]   ;;  %s1864_s6 = inlined_call_operand.vmem [shape: f32[1,10], index: 6, kind: input, shape index: {}]   ;;  %s1865_s7 = inlined_call_operand.hbm [shape: f32[10,10], index: 7, kind: output, shape index: {}]  }
   0x1   :  { %14 = vsyncpa [#allocation3 + $0x1], 0  ;;  %s1548_s24 = smov 0   ;;  %s1550_s25 = smov 0  }
   0x2   :  { %s1552_s26 = smov 0   ;;  %s1554_s27 = smov 0  }
   0x3 LB: > { %s1569_s28 = sadd.s32 4294967295, %s1503_s27   ;;  %s1140_s29 = sadd.s32 4294967294, %s1503_s27   ;;  %s1503_s27 = sphi %s1554_s27, %s1871_s27   ;;  %s1499_s26 = sphi %s1552_s26, %s1870_s26   ;;  %s1495_s25 = sphi %s1550_s25, %s1869_s25   ;;  %s1491_s24 = sphi %s1548_s24, %s1868_s24  }
   0x4   : > { %s1573_s30 = sadd.s32 1, %s1503_s27   ;;  %s179_s8 = sadd.s32 1, %s1499_s26 }
   0x5   : > { %s176_s9 = ssub.s32 %s1503_s27, %s1573_s30  ;;  %p189_p0 = scmp.ne.s32.totalorder %s1499_s26, %s1495_s25 }
   0x6   : > { %p177_p1 = scmp.eq.s32.totalorder %s176_s9, 0  ;;  %p190_p2 = scmp.eq.s32.totalorder %s1569_s28, 1 }
   0x7   : > { %p195_p3 = scmp.ne.s32.totalorder %s1495_s25, %s1491_s24  ;;  %p196_p4 = scmp.eq.s32.totalorder %s1140_s29, 1 }
   0x8   : > { %s1584_s10 = scalar_select %p177_p1, %s1499_s26, %s179_s8  }
   0x9   : > { %p1586_p5 = por %p190_p2, %p189_p0  ;;  %p1590_p6 = por %p196_p4, %p195_p3 }
   0xa   : > { %p1143_p7 = scmp.ge.s32.totalorder %s1503_s27, 1  ;;  %p240_p8 = scmp.lt.s32.totalorder %s1503_s27, 3 }
   0xc   : > { %p241_p9 = pnand %p1143_p7, %p240_p8 }
   0xd   : > { %p272_p10 = scmp.lt.s32.totalorder (!%p241_p9), %s1569_s28, 1  ;;  %s269_s29 = sand.u32 (!%p241_p9), 1, %s1495_s25  }
   0xe   : > { %244 = sbr.rel (%p241_p9) target bundleno = 1010 (0x3f2), region = 48  ;;  %s1068_s17 = scalar_lea.sflag (!%p241_p9), [#allocation3], %s269_s29 }
   0xf   : > { %s1507_s18 = smov (!%p241_p9), [#allocation2]  }
  0x10   : > { %s1447_s20 = sshll.u32 (!%p241_p9), %s1507_s18, 4  ;;  %s1448_s20 = int_to_ptr.vmem [resolvable:$false] %s1447_s20 }
  0x13   : > { %v1378_v0 = vld [vmem:[%s1859_s1 + $0x78] sm:$0xff]   ;;  %v1382_v4 = vld [vmem:[%s1859_s1 + $0x70] sm:$0xff]   ;;  %v1386_v8 = vld [vmem:[%s1859_s1 + $0x68] sm:$0xff]   ;;  %s273_s13 = scalar_select %p272_p10, %s1569_s28, 1  ;;  %v1505_v44 = vmov 0.0   ;;  %vm1506_vm0 = vmmov 0  }
  0x14   : > { %v1379_v1 = vld [vmem:[%s1859_s1 + $0x38] sm:$0xff]   ;;  %1216 = vmatprep.subr.bf16.mxu0 %v1378_v0  ;;  %v1383_v5 = vld [vmem:[%s1859_s1 + $0x30] sm:$0xff]   ;;  %v1387_v9 = vld [vmem:[%s1859_s1 + $0x28] sm:$0xff]   ;;  %vm691_vm1 = vcmask 130048   ;;  %vm1009_vm2 = vcmask 523264   ;;  %vm1053_vm3 = vcmask 80896  }
  0x15   : > { %v1380_v2 = vld [vmem:[%s1859_s1 + $0xf8] sm:$0xff]   ;;  %1217 = vmatpush3.bf16.msra.mxu0 %v1379_v1  ;;  %v1384_v6 = vld [vmem:[%s1859_s1 + $0xf0] sm:$0xff]   ;;  %v1388_v10 = vld [vmem:[%s1859_s1 + $0xe8] sm:$0xff]   ;;  %s1336_s22 = smul.u32 56, %s273_s13 }
  0x16   : > { %v1381_v3 = vld [vmem:[%s1859_s1 + $0xb8] sm:$0xff]   ;;  %1238 = vmatprep.subr.bf16.mxu1 %v1380_v2  ;;  %1218 = vmatprep.subr.bf16.mxu0 %v1382_v4  ;;  %v1385_v7 = vld [vmem:[%s1859_s1 + $0xb0] sm:$0xff]   ;;  %v1389_v11 = vld [vmem:[%s1859_s1 + $0xa8] sm:$0xff]  }
  0x17   : > { %1239 = vmatpush3.bf16.msra.mxu1 %v1381_v3  ;;  %v1390_v12 = vld [vmem:[%s1859_s1 + $0x60] sm:$0xff]   ;;  %v1394_v16 = vld [vmem:[%s1859_s1 + $0x58] sm:$0xff]   ;;  %v1398_v20 = vld [vmem:[%s1859_s1 + $0x50] sm:$0xff]   ;;  %s1688_s19 = scalar_lea.vmem %s1858_s0, %s1336_s22  ;;  %s1144_s22 = sshll.u32 %s269_s29, 3 }
  0x18   : > { %1240 = vmatprep.subr.bf16.mxu1 %v1384_v6  ;;  %v1391_v13 = vld [vmem:[%s1859_s1 + $0x20] sm:$0xff]   ;;  %v1395_v17 = vld [vmem:[%s1859_s1 + $0x18] sm:$0xff]   ;;  %v1399_v21 = vld [vmem:[%s1859_s1 + $0x10] sm:$0xff]   ;;  %s271_s8 = scalar_lea.vmem [#allocation2], %s1144_s22 }
  0x19   : > { %1219 = vmatpush3.bf16.msra.mxu0 %v1383_v5  ;;  %v1392_v14 = vld [vmem:[%s1859_s1 + $0xe0] sm:$0xff]   ;;  %v1396_v18 = vld [vmem:[%s1859_s1 + $0xd8] sm:$0xff]   ;;  %v1400_v22 = vld [vmem:[%s1859_s1 + $0xd0] sm:$0xff]   ;;  %s1081_s9 = sshll.u32 %s271_s8, 4  ;;  %s1082_s9 = int_to_ptr.vmem [resolvable:$true] %s1081_s9 }
  0x1a   : > { %1220 = vmatprep.subr.bf16.mxu0 %v1386_v8  ;;  %v1393_v15 = vld [vmem:[%s1859_s1 + $0xa0] sm:$0xff]   ;;  %v1397_v19 = vld [vmem:[%s1859_s1 + $0x98] sm:$0xff]   ;;  %v1401_v23 = vld [vmem:[%s1859_s1 + $0x90] sm:$0xff]   ;;  %s1443_s13 = scalar_lea.vmem %s1082_s9, 128  ;;  %p1450_p0 = scmp.lt.s32.totalorder %s1082_s9, %s1448_s20 }
  0x1b   : > { %1241 = vmatpush3.bf16.msra.mxu1 %v1385_v7  ;;  %v1402_v24 = vld [vmem:[%s1859_s1 + $0x48] sm:$0xff]   ;;  %v1406_v28 = vld [vmem:[%s1859_s1 + $0x40] sm:$0xff]   ;;  %v1410_v36 = vld [vmem:[%s1859_s1 + $0x178] sm:$0xff]   ;;  %p1444_p11 = scmp.ne.s32.totalorder %s1082_s9, %s1443_s13 }
  0x1c   : > { %1242 = vmatprep.subr.bf16.mxu1 %v1388_v10  ;;  %v1403_v25 = vld [vmem:[%s1859_s1 + $0x8] sm:$0xff]   ;;  %v1407_v29 = vld [vmem:[%s1859_s1] sm:$0xff]   ;;  %v281_v37 = vld [vmem:[%s1688_s19 + $0x18] sm:$0xff] }
  0x1d   : > { %1221 = vmatpush3.bf16.msra.mxu0 %v1387_v9  ;;  %v1404_v26 = vld [vmem:[%s1859_s1 + $0xc8] sm:$0xff]   ;;  %v1408_v30 = vld [vmem:[%s1859_s1 + $0xc0] sm:$0xff]   ;;  %v288_v38 = vpack.c.bf16 %v281_v37, %v281_v37  ;;  %v1411_v39 = vld [vmem:[%s1859_s1 + $0x138] sm:$0xff]   ;;  %p1445_p12 = pnand %p1444_p11, %p1586_p5 }
  0x1e   : > { %1222 = vmatprep.subr.bf16.mxu0 %v1390_v12  ;;  %v1405_v27 = vld [vmem:[%s1859_s1 + $0x88] sm:$0xff]   ;;  %v1409_v33 = vld [vmem:[%s1859_s1 + $0x80] sm:$0xff]   ;;  %v280_v40 = vld [vmem:[%s1688_s19 + $0x10] sm:$0xff] }
  0x1f   : > { %1243 = vmatpush3.bf16.msra.mxu1 %v1389_v11  ;;  %v279_v31 = vld [vmem:[%s1688_s19 + $0x8] sm:$0xff]  ;;  %v278_v34 = vld [vmem:[%s1688_s19] sm:$0xff]  ;;  %767 = vmatprep.mubr.bf16.mxu1 %v288_v38  ;;  %v287_v41 = vpack.c.bf16 %v280_v40, %v280_v40  ;;  %v1412_v42 = vld [vmem:[%s1859_s1 + $0x170] sm:$0xff]   ;;  %p1446_p13 = pneg %p1445_p12 }
  0x20   : > { %1244 = vmatprep.subr.bf16.mxu1 %v1392_v14  ;;  %v286_v32 = vpack.c.bf16 %v279_v31, %v279_v31  ;;  %v285_v35 = vpack.c.bf16 %v278_v34, %v278_v34  ;;  %v1413_v43 = vld [vmem:[%s1859_s1 + $0x130] sm:$0xff]   ;;  %v1414_v45 = vld [vmem:[%s1859_s1 + $0x168] sm:$0xff]   ;;  %v1416_v47 = vld [vmem:[%s1859_s1 + $0x160] sm:$0xff]  }
  0x21   : > { %1223 = vmatpush3.bf16.msra.mxu0 %v1391_v13  ;;  %v1415_v46 = vld [vmem:[%s1859_s1 + $0x128] sm:$0xff]   ;;  %v1417_v48 = vld [vmem:[%s1859_s1 + $0x120] sm:$0xff]   ;;  %v1418_v49 = vld [vmem:[%s1859_s1 + $0x158] sm:$0xff]  }
  0x22   : > { %1224 = vmatprep.subr.bf16.mxu0 %v1394_v16  ;;  %727 = vmatprep.mubr.bf16.mxu0 %v286_v32  ;;  %v1419_v50 = vld [vmem:[%s1859_s1 + $0x118] sm:$0xff]   ;;  %v1420_v51 = vld [vmem:[%s1859_s1 + $0x150] sm:$0xff]   ;;  %v1426_v53 = vld [vmem:[%s1859_s1 + $0x180] sm:$0xff]  }
  0x23   : > { %1245 = vmatpush3.bf16.msra.mxu1 %v1393_v15  ;;  %v1421_v52 = vld [vmem:[%s1859_s1 + $0x110] sm:$0xff]   ;;  %v283_v54 = vld [vmem:[%s1688_s19 + $0x28] sm:$0xff]  ;;  %v1424_v60 = vld [vmem:[%s1859_s1 + $0x140] sm:$0xff]  }
  0x24   : > { %1246 = vmatprep.subr.bf16.mxu1 %v1396_v18  ;;  %v1422_v55 = vld [vmem:[%s1859_s1 + $0x148] sm:$0xff]   ;;  %v290_v56 = vpack.c.bf16 %v283_v54, %v283_v54  ;;  %v284_v57 = vld [vmem:[%s1688_s19 + $0x30] sm:$0xff]  ;;  %v1425_v61 = vld [vmem:[%s1859_s1 + $0x100] sm:$0xff]  }
  0x25   : > { %1225 = vmatpush3.bf16.msra.mxu0 %v1395_v17  ;;  %v291_v58 = vpack.c.bf16 %v284_v57, %v284_v57  ;;  %v1423_v59 = vld [vmem:[%s1859_s1 + $0x108] sm:$0xff]   ;;  %v282_v62 = vld [vmem:[%s1688_s19 + $0x20] sm:$0xff]  ;;  %v1427_v0 = vld [vmem:[%s1861_s3 + $0x38] sm:$0xff]   ;;  %s1213_s19 = sshll.u32 %s1569_s28, 7  ;;  %s1449_s28 = scalar_lea.vmem %s1448_s20, 256 }
  0x26   : > { %1226 = vmatprep.subr.bf16.mxu0 %v1398_v20  ;;  %v289_v63 = vpack.c.bf16 %v282_v62, %v282_v62  ;;  %v1428_v1 = vld [vmem:[%s1861_s3 + $0x30] sm:$0xff]   ;;  %v1429_v2 = vld [vmem:[%s1861_s3 + $0x28] sm:$0xff]   ;;  %v1430_v3 = vld [vmem:[%s1861_s3 + $0x20] sm:$0xff]   ;;  %s1079_s16 = scalar_lea.hbm %s1865_s7, %s1213_s19  ;;  %p1451_p1 = scmp.lt.s32.totalorder %s1449_s28, %s1443_s13 }
  0x27   : > { %1247 = vmatpush3.bf16.msra.mxu1 %v1397_v19  ;;  %v1431_v4 = vld [vmem:[%s1861_s3 + $0x18] sm:$0xff]   ;;  %v1432_v5 = vld [vmem:[%s1861_s3 + $0x10] sm:$0xff]   ;;  %v1433_v6 = vld [vmem:[%s1861_s3 + $0x8] sm:$0xff]  }
  0x28   : > { %1248 = vmatprep.subr.bf16.mxu1 %v1400_v22  ;;  %v1434_v7 = vld [vmem:[%s1861_s3] sm:$0xff]   ;;  %v1435_v8 = vld [vmem:[%s1863_s5 + $0x18] sm:$0xff]   ;;  %v1436_v9 = vld [vmem:[%s1863_s5 + $0x10] sm:$0xff]   ;;  %p1452_p2 = por %p1451_p1, %p1450_p0 }
  0x29   : > { %1227 = vmatpush3.bf16.msra.mxu0 %v1399_v21  ;;  %v1438_v37 = vld [vmem:[%s1863_s5] sm:$0xff]  }
  0x2a   : > { %1228 = vmatprep.subr.bf16.mxu0 %v1402_v24  ;;  %v1197_v38 = vld [vmem:[%s1862_s4] ss:$0 sm:$0xff]  ;;  %p1453_p3 = pnand %p1452_p2, %p1446_p13 }
  0x2b   : > { %1249 = vmatpush3.bf16.msra.mxu1 %v1401_v23  ;;  %v1146_v23 = vld [vmem:[%s1860_s2] ss:$0 sm:$0xff] }
  0x2c   : > { %1250 = vmatprep.subr.bf16.mxu1 %v1404_v26 }
  0x2d   : > { %1229 = vmatpush3.bf16.msra.mxu0 %v1403_v25 }
  0x2e   : > { %1230 = vmatprep.subr.bf16.mxu0 %v1406_v28 }
  0x2f   : > { %1251 = vmatpush3.bf16.msra.mxu1 %v1405_v27 }
  0x30   : > { %1252 = vmatprep.subr.bf16.mxu1 %v1408_v30 }
  0x31   : > { %1231 = vmatpush3.bf16.msra.mxu0 %v1407_v29 }
  0x32   : > { %1260 = vmatprep.subr.bf16.mxu0 %v1410_v36  ;;  %v1437_v36 = vld [vmem:[%s1863_s5 + $0x8] sm:$0xff]  }
  0x33   : > { %1253 = vmatpush3.bf16.msra.mxu1 %v1409_v33 }
  0x34   : > { %728 = vmatmul.mubr.bf16.vlgmr.msra.gmra.mxu0 %v285_v35  ;;  %1298 = vmatprep.subr.bf16.mxu1 %v1505_v44 }
  0x35   : > { %1261 = vmatpush3.bf16.msra.mxu0 %v1411_v39  ;;  %807 = vmatprep.mubr.bf16.mxu0 %v290_v56 }
  0x36   : > { %768 = vmatmul.mubr.bf16.vlgmr.msra.gmra.mxu1 %v287_v41  ;;  %1262 = vmatprep.subr.bf16.mxu0 %v1412_v42 }
  0x37   : > { %1300 = vmatprep.mubr.msk.bf16.mxu1 %vm1506_vm0, %v1505_v44  ;;  %1299 = vmatpush3.bf16.msra.mxu1 %v1426_v53 }
  0x38   : > { %1304 = vmatprep.subr.bf16.mxu1 %v1505_v44 }
  0x39   : > { %1263 = vmatpush3.bf16.msra.mxu0 %v1413_v43 }
  0x3a   : > { %1264 = vmatprep.subr.bf16.mxu0 %v1414_v45 }
  0x3d   : > { %1265 = vmatpush3.bf16.msra.mxu0 %v1415_v46 }
  0x3e   : > { %1266 = vmatprep.subr.bf16.mxu0 %v1416_v47  ;;  %1301 = vmatmul.mubr.msk.bf16.vlgmr.msra.gmra.mxu1 %vm691_vm1, %v291_v58 }
  0x3f   : > { %1320 = vmatprep.mubr.msk.bf16.mxu1 %vm1506_vm0, %v1505_v44  ;;  %1305 = vmatpush3.bf16.msra.mxu1 %v1427_v0 }
  0x40   : > { %1306 = vmatprep.subr.bf16.mxu1 %v1505_v44 }
  0x41   : > { %1267 = vmatpush3.bf16.msra.mxu0 %v1417_v48 }
  0x42   : > { %1268 = vmatprep.subr.bf16.mxu0 %v1418_v49 }
  0x43   : > { %1307 = vmatpush3.bf16.msra.mxu1 %v1428_v1 }
  0x44   : > { %1308 = vmatprep.subr.bf16.mxu1 %v1505_v44 }
  0x45   : > { %1269 = vmatpush3.bf16.msra.mxu0 %v1419_v50 }
  0x46   : > { %1270 = vmatprep.subr.bf16.mxu0 %v1420_v51 }
  0x47   : > { %1309 = vmatpush3.bf16.msra.mxu1 %v1429_v2 }
  0x48   : > { %1310 = vmatprep.subr.bf16.mxu1 %v1505_v44 }
  0x49   : > { %1271 = vmatpush3.bf16.msra.mxu0 %v1421_v52 }
  0x4a   : > { %1272 = vmatprep.subr.bf16.mxu0 %v1422_v55 }
  0x4b   : > { %1311 = vmatpush3.bf16.msra.mxu1 %v1430_v3 }
  0x4c   : > { %1312 = vmatprep.subr.bf16.mxu1 %v1505_v44 }
  0x4d   : > { %1273 = vmatpush3.bf16.msra.mxu0 %v1423_v59 }
  0x4e   : > { %1274 = vmatprep.subr.bf16.mxu0 %v1424_v60 }
  0x4f   : > { %1313 = vmatpush3.bf16.msra.mxu1 %v1431_v4 }
  0x50   : > { %1314 = vmatprep.subr.bf16.mxu1 %v1505_v44 }
  0x51   : > { %1275 = vmatpush3.bf16.msra.mxu0 %v1425_v61 }
  0x52   : > { %1324 = vmatprep.subr.bf16.mxu0 %v1505_v44 }
  0x53   : > { %1315 = vmatpush3.bf16.msra.mxu1 %v1432_v5 }
  0x54   : > { %808 = vmatmul.mubr.bf16.vlgmr.msra.gmra.mxu0 %v289_v63  ;;  %1316 = vmatprep.subr.bf16.mxu1 %v1505_v44 }
  0x55   : > { %1332 = vmatprep.mubr.msk.bf16.mxu0 %vm1506_vm0, %v1505_v44  ;;  %1325 = vmatpush3.bf16.msra.mxu0 %v1435_v8 }
  0x56   : > { %1326 = vmatprep.subr.bf16.mxu0 %v1505_v44 }
  0x57   : > { %1317 = vmatpush3.bf16.msra.mxu1 %v1433_v6 }
  0x58   : > { %1318 = vmatprep.subr.bf16.mxu1 %v1505_v44 }
  0x59   : > { %1327 = vmatpush3.bf16.msra.mxu0 %v1436_v9 }
  0x5a   : > { %1328 = vmatprep.subr.bf16.mxu0 %v1505_v44 }
  0x5b   : > { %1319 = vmatpush3.bf16.msra.mxu1 %v1434_v7 }
  0x5d   : > { %1329 = vmatpush3.bf16.msra.mxu0 %v1437_v36 }
  0x5e   : > { %1330 = vmatprep.subr.bf16.mxu0 %v1505_v44  ;;  %v1206_v44 = vld [vmem:[%s1864_s6] ss:$0 sm:$0xff] }
  0x61   : > { %1331 = vmatpush3.bf16.msra.mxu0 %v1438_v37 }
  0xf4   : > { %v1232_v10 = vpop.f32.mrf.mxu0 }
  0xf6   : > { %v1233_v11 = vpop.f32.mrf.mxu0  ;;  %v1254_v12 = vpop.f32.mrf.mxu1 }
  0xf7   : > { %v1234_v22 = vadd.f32 %v1233_v11, %v1232_v10 }
  0xf8   : > { %v1235_v13 = vpop.f32.mrf.mxu0  ;;  %v1255_v14 = vpop.f32.mrf.mxu1 }
  0xf9   : > { %v730_v24 = vadd.f32 %v1234_v22, %v1146_v23  ;;  %v1256_v25 = vadd.f32 %v1255_v14, %v1254_v12 }
  0xfa   : > { %v1236_v15 = vpop.f32.mrf.mxu0  ;;  %v1257_v16 = vpop.f32.mrf.mxu1 }
  0xfb   : > { %v770_v28 = vadd.f32 %v1256_v25, %v730_v24 }
  0xfc   : > { %v1258_v17 = vpop.f32.mrf.mxu1 }
  0xfe   : > { %v849_v18 = vpop.f32.mrf.mxu1 }
 0x100   : > { %v1302_v19 = vpop.f32.mrf.mxu1 }
 0x102   : > { %v852_v20 = vpop.f32.mrf.mxu1 }
 0x104   : > { %v1303_v21 = vpop.f32.mrf.mxu1 }
 0x114   : > { %v1276_v26 = vpop.f32.mrf.mxu0 }
 0x116   : > { %v1277_v27 = vpop.f32.mrf.mxu0 }
 0x117   : > { %v1278_v29 = vadd.f32 %v1277_v27, %v1276_v26 }
 0x118   : > { %v1279_v30 = vpop.f32.mrf.mxu0 }
 0x119   : > { %v810_v31 = vadd.f32 %v1278_v29, %v770_v28 }
 0x11a   : > { %v1280_v32 = vpop.f32.mrf.mxu0 }
 0x11b   : > { %v850_v33 = vadd.f32 %v849_v18, %v810_v31 }
 0x11d   : > { %v855_v34 = vmax.f32 %v850_v33, 0.0 }
 0x11f   : > { %v856_v35 = vpack.c.bf16 %v855_v34, %v855_v34 }
 0x121   : > { %1321 = vmatmul.mubr.bf16.vlgmr.msra.gmra.mxu1 %v856_v35 }
 0x1e1   : > { %v962_v39 = vpop.f32.mrf.mxu1 }
 0x1e2   : > { %v963_v40 = vadd.f32 %v1197_v38, %v962_v39 }
 0x1e3   : > { %v1322_v41 = vpop.f32.mrf.mxu1 }
 0x1e4   : > { %v968_v42 = vmax.f32 %v963_v40, 0.0 }
 0x1e5   : > { %v965_v43 = vpop.f32.mrf.mxu1 }
 0x1e6   : > { %v969_v45 = vpack.c.bf16 %v968_v42, %v968_v42 }
 0x1e7   : > { %v1323_v46 = vpop.f32.mrf.mxu1 }
 0x1e8   : > { %1333 = vmatmul.mubr.msk.bf16.vlgmr.msra.gmra.mxu0 %vm1009_vm2, %v969_v45 }
 0x2a8   : > { %v1047_v47 = vpop.f32.mrf.mxu0 }
 0x2a9   : > { %v1048_v48 = vadd.f32 %v1206_v44, %v1047_v47 }
 0x2aa   : > { %v1334_v49 = vpop.f32.mrf.mxu0 }
 0x2ab   : > { %v1054_v50 = vsel %vm1053_vm3, %v1048_v48, -inf }
 0x2ac   : > { %1055 = vmax.xlane.f32.xlu0 %v1054_v50  ;;  %v1050_v51 = vpop.f32.mrf.mxu0 }
 0x2ae   : > { %v1335_v52 = vpop.f32.mrf.mxu0 }
 0x335   : > { %v1056_v53 = vpop.xlane.xlu0 %1055 }
 0x336   : > { %v1057_v54 = vsub.f32 %v1048_v48, %v1056_v53 }
 0x338   : > { %v1058_v55 = vmul.f32 1.442695, %v1057_v54 }
 0x33a   : > { %1439 = vpow2.f32 %v1058_v55 }
 0x347   : > { %v1440_v56 = vpop.eup %1439 }
 0x348   : > { %v1060_v57 = vsel %vm1053_vm3, %v1440_v56, 0.0 }
 0x349   : > { %1061 = vadd.xlane.f32.xlu0 %v1060_v57 }
 0x3d2   : > { %v1062_v58 = vpop.xlane.xlu0 %1061 }
 0x3d3   : > { %1441 = vlog2.f32 %v1062_v58 }
 0x3e0   : > { %v1442_v59 = vpop.eup %1441 }
 0x3e1   : > { %v1064_v60 = vmul.f32 0.6931472, %v1442_v59 }
 0x3e3   : > { %v1065_v61 = vsub.f32 %v1057_v54, %v1064_v60 }
 0x3e5   : > { %1066 = vst.msk [vmem:[%s271_s8] sm:$0xff] %vm1053_vm3, %v1065_v61 }
 0x3e6   : > { %1456 = shalt.err (!%p1453_p3)
}
 0x3e7   : > { %s1457_s21 = scalar_lea.hbm %s1079_s16, 128  ;;  %s1461_s22 = scalar_lea.hbm %s1865_s7, 256 }
 0x3e8   : > { %p1458_p4 = scmp.ne.s32.totalorder %s1079_s16, %s1457_s21  ;;  %p1462_p9 = scmp.lt.s32.totalorder %s1079_s16, %s1865_s7 }
 0x3e9   : > { %p1463_p10 = scmp.lt.s32.totalorder %s1461_s22, %s1457_s21 }
 0x3ea   : > { %p1459_p7 = pnand %p1458_p4, %p1586_p5 }
 0x3eb   : > { %p1464_p11 = por %p1463_p10, %p1462_p9 }
 0x3ec   : > { %p1460_p8 = pneg %p1459_p7 }
 0x3ee   : > { %p1465_p12 = pnand %p1464_p11, %p1460_p8 }
 0x3f0   : > { %1468 = shalt.err (!%p1465_p12)
}
 0x3f1   : > { %1337 = dma.vmem_to_hbm [thread:$0]  (%p1586_p5), %s1082_s9, 128, %s1079_s16, %s1068_s17  }
 0x3f2 PF: > { %p1343_p13 = scmp.ge.s32.totalorder %s1503_s27, 2  ;;  %s1093_s14 = sand.u32 1, %s1491_s24  }
 0x3f3   : > { %s1094_s15 = scalar_lea.sflag [#allocation3], %s1093_s14 }
 0x3f4   : > { %p1340_p0 = pnand %p1343_p13, %p1590_p6 }
 0x3f6   : > { %p1341_p1 = pneg %p1340_p0 }
 0x3f8   : > { %1486 = dma.done.wait (%p1341_p1), %s1094_s15, 128  }
 0x3f9   : > { %1488 = vsyncadd (%p1341_p1), %s1094_s15, 4294967168  ;;  %p17_p2 = scmp.ge.s32.totalorder %s1573_s30, 4   ;;  %s1868_s24 = smov %s1495_s25 }
 0x3fa   : > { %s1869_s25 = smov %s1499_s26  ;;  %s1870_s26 = smov %s1584_s10 }
 0x3fb   : > { %s1871_s27 = smov %s1573_s30  ;;  %19 = sbr.rel (!%p17_p2) target bundleno = 3 (0x3), region = 83 }
 0x400   :  { %1099 = vsyncpa [#allocation3], 1 }
 0x401   :  { %1101 = vsyncpa [#allocation3 + $0x1], 1 }

</bundles_post_ra>
